<compile_context>
chip_gen: v5e
topology: v5e:2x2
jax: 0.10.0
libtpu: 0.0.40
codegen_flags: <defaults>
</compile_context>

<pallas_src>
import jax
import jax.numpy as jnp
from jax.experimental import pallas as pl
from jax.experimental.pallas import tpu as pltpu

# Problem sizes (small, consistent with a 4-channel 16x16 input; batch raised
# per review so the kernel is actually tiled over a parallel grid axis).
N, CIN, H, W = 32, 4, 16, 16
CMID = 8
NUM_CLASSES = 10
KH = KW = 3
K = CIN * KH * KW            # im2col contraction size = 36
HW = H * W                   # 256 pixels per image
TB = 8                       # images per grid step -> 2048 lanes per step
NUM_TILES = N // TB
assert N % TB == 0


def ensemble_kernel(pt_ref, w1b_ref, w2b_ref, out_ref):
    # pt_ref : [K, TB*HW]            transposed im2col patches (lane-dense)
    # w1b_ref: [CMID, K+1]           packed [conv weight | conv bias]
    # w2b_ref: [NUM_CLASSES, CMID+1] packed [linear weight^T | linear bias]
    # out_ref: [NUM_CLASSES, TB]     transposed logits for this batch tile

    w1b = w1b_ref[...]
    w1t = w1b[:, :K]                                    # [CMID, K]
    b1 = w1b[:, K:K + 1]                                # [CMID, 1]

    # model1: Conv2d(CIN, CMID, 3, pad=1) as a lane-dense matmul + bias + ReLU.
    y1 = jnp.dot(w1t, pt_ref[...],
                 preferred_element_type=jnp.float32)    # [CMID, TB*HW]
    y1 = jnp.maximum(y1 + b1, 0.0)

    # model2: Linear applied before the (commuting) global average pool so the
    # per-image XLU lane reduction directly produces an output column.
    w2b = w2b_ref[...]
    w2t = w2b[:, :CMID]                                 # [NC, CMID]
    b2 = w2b[:, CMID:CMID + 1]                          # [NC, 1]
    z = jnp.dot(w2t, y1,
                preferred_element_type=jnp.float32)     # [NC, TB*HW]

    # Per-image pooling: static 256-lane (tile-aligned) slices + lane sums,
    # assembled into a dense [NC, TB] tile with iota masks (single full store).
    lane_ids = jax.lax.broadcasted_iota(jnp.int32, (NUM_CLASSES, TB), 1)
    logits_t = jnp.zeros((NUM_CLASSES, TB), jnp.float32)
    for b in range(TB):                                 # static, unrolled
        col = jnp.sum(z[:, b * HW:(b + 1) * HW], axis=1, keepdims=True)
        logits_t = logits_t + jnp.where(lane_ids == b, col, 0.0)
    out_ref[...] = (logits_t * (1.0 / HW) + b2).astype(out_ref.dtype)


def _im2col_transposed(x_nchw):
    """[N, CIN, H, W] -> [K, N*H*W], k-order=(cin,kh,kw), col-order=(n,h,w)."""
    xp = jnp.pad(x_nchw, ((0, 0), (0, 0), (1, 1), (1, 1)))
    wins = [xp[:, :, dh:dh + H, dw:dw + W]              # [N, CIN, H, W]
            for dh in range(KH) for dw in range(KW)]
    pt = jnp.stack(wins, axis=2)                        # [N, CIN, 9, H, W]
    pt = pt.transpose(1, 2, 0, 3, 4)                    # [CIN, 9, N, H, W]
    return pt.reshape(K, N * HW)


@jax.jit
def ensemble_forward(x_nchw, w1_conv, b1, w2, b2):
    """Ensemble_model.forward: model2(model1(x)).  x_nchw: [N, CIN, H, W]."""
    patches_t = _im2col_transposed(x_nchw)                              # [K, M]
    w1b = jnp.concatenate([w1_conv.reshape(CMID, K),
                           b1.reshape(CMID, 1)], axis=1)                # [CMID, K+1]
    w2b = jnp.concatenate([w2.T,
                           b2.reshape(NUM_CLASSES, 1)], axis=1)         # [NC, CMID+1]

    out_t = pl.pallas_call(
        ensemble_kernel,
        out_shape=jax.ShapeDtypeStruct((NUM_TILES, NUM_CLASSES, TB),
                                       jnp.float32),
        grid=(NUM_TILES,),
        in_specs=[
            pl.BlockSpec((K, TB * HW), lambda i: (0, i)),
            pl.BlockSpec((CMID, K + 1), lambda i: (0, 0)),
            pl.BlockSpec((NUM_CLASSES, CMID + 1), lambda i: (0, 0)),
        ],
        out_specs=pl.BlockSpec((None, NUM_CLASSES, TB), lambda i: (i, 0, 0)),
        compiler_params=pltpu.CompilerParams(
            dimension_semantics=("parallel",)),
    )(patches_t, w1b, w2b)

    # Tiny (N x NUM_CLASSES) relayout back to batch-major logits (fused by jit).
    return out_t.transpose(0, 2, 1).reshape(N, NUM_CLASSES)


if __name__ == "__main__":
    key = jax.random.PRNGKey(0)
    kx, kw1, kb1, kw2, kb2 = jax.random.split(key, 5)

    # deterministic synthetic parameters (no checkpoint loading)
    x = jax.random.normal(kx, (N, CIN, H, W), jnp.float32)
    w1_conv = jax.random.normal(kw1, (CMID, CIN, KH, KW), jnp.float32) * 0.1
    b1 = jax.random.normal(kb1, (CMID,), jnp.float32) * 0.1
    w2 = jax.random.normal(kw2, (CMID, NUM_CLASSES), jnp.float32) * 0.1
    b2 = jax.random.normal(kb2, (NUM_CLASSES,), jnp.float32) * 0.1

    out = ensemble_forward(x, w1_conv, b1, w2, b2)
    out = jax.block_until_ready(out)

    # pure-JAX reference of the same ensemble forward (sanity check)
    y = jax.lax.conv_general_dilated(
        x, w1_conv, window_strides=(1, 1), padding="SAME",
        dimension_numbers=("NCHW", "OIHW", "NCHW"))
    y = jax.nn.relu(y + b1[None, :, None, None])
    ref = y.mean(axis=(2, 3)) @ w2 + b2

    assert out.shape == (N, NUM_CLASSES)
    # Both kernel and reference use the MXU's default f32 (bf16-pass) matmul
    # precision, and the kernel pools after the commuting linear layer, so
    # allow a small (<~1e-3) numerical discrepancy.
    assert jnp.allclose(out, ref, atol=2e-3, rtol=2e-3), "mismatch vs reference"
    print("KERNEL_OK")
</pallas_src>

<mosaic_0001>
module attributes {stable_mosaic.version = 11 : i64} {
  func.func @ensemble_kernel(%arg0: i32, %arg1: memref<36x2048xf32, #tpu.memory_space<vmem>>, %arg2: memref<8x37xf32, #tpu.memory_space<vmem>>, %arg3: memref<10x9xf32, #tpu.memory_space<vmem>>, %arg4: memref<1x10x8xf32, #tpu.memory_space<vmem>>) attributes {dimension_semantics = [#tpu.dimension_semantics<parallel>], iteration_bounds = array<i64: 4>, scalar_prefetch = 0 : i64, scratch_operands = 0 : i64, tpu.core_type = #tpu.core_type<tc>, window_params = [{transform_indices = @transform_0, window_bounds = array<i64: 36, 2048>}, {pipeline_mode = #tpu.pipeline_mode<synchronous>, transform_indices = @transform_1, window_bounds = array<i64: 8, 37>}, {pipeline_mode = #tpu.pipeline_mode<synchronous>, transform_indices = @transform_2, window_bounds = array<i64: 10, 9>}, {transform_indices = @transform_3, window_bounds = array<i64: 1, 10, 8>}]} {
    %c0 = arith.constant 0 : index
    %c0_0 = arith.constant 0 : index
    %0 = vector.load %arg2[%c0, %c0_0] : memref<8x37xf32, #tpu.memory_space<vmem>>, vector<8x37xf32>
    %1 = vector.extract_strided_slice %0 {offsets = [0, 0], sizes = [8, 36], strides = [1, 1]} : vector<8x37xf32> to vector<8x36xf32>
    %2 = vector.extract_strided_slice %0 {offsets = [0, 36], sizes = [8, 1], strides = [1, 1]} : vector<8x37xf32> to vector<8x1xf32>
    %c0_1 = arith.constant 0 : index
    %c0_2 = arith.constant 0 : index
    %3 = vector.load %arg1[%c0_1, %c0_2] : memref<36x2048xf32, #tpu.memory_space<vmem>>, vector<36x2048xf32>
    %cst = arith.constant dense<0.000000e+00> : vector<8x2048xf32>
    %4 = tpu.matmul %1, %3, %cst {dimension_numbers = #tpu.dot_dimension_numbers<[1], [0], [0], [1], [0, 0, 1, 1], [], []>} : vector<8x36xf32>, vector<36x2048xf32>, vector<8x2048xf32> -> vector<8x2048xf32>
    %5 = vector.broadcast %2 : vector<8x1xf32> to vector<8x2048xf32>
    %6 = arith.addf %4, %5 : vector<8x2048xf32>
    %cst_3 = arith.constant 0.000000e+00 : f32
    %7 = vector.broadcast %cst_3 : f32 to vector<8x2048xf32>
    %8 = arith.maximumf %6, %7 : vector<8x2048xf32>
    %c0_4 = arith.constant 0 : index
    %c0_5 = arith.constant 0 : index
    %9 = vector.load %arg3[%c0_4, %c0_5] : memref<10x9xf32, #tpu.memory_space<vmem>>, vector<10x9xf32>
    %10 = vector.extract_strided_slice %9 {offsets = [0, 0], sizes = [10, 8], strides = [1, 1]} : vector<10x9xf32> to vector<10x8xf32>
    %11 = vector.extract_strided_slice %9 {offsets = [0, 8], sizes = [10, 1], strides = [1, 1]} : vector<10x9xf32> to vector<10x1xf32>
    %cst_6 = arith.constant dense<0.000000e+00> : vector<10x2048xf32>
    %12 = tpu.matmul %10, %8, %cst_6 {dimension_numbers = #tpu.dot_dimension_numbers<[1], [0], [0], [1], [0, 0, 1, 1], [], []>} : vector<10x8xf32>, vector<8x2048xf32>, vector<10x2048xf32> -> vector<10x2048xf32>
    %13 = tpu.iota {dimensions = array<i32: 1>} : vector<10x8xi32>
    %cst_7 = arith.constant 0.000000e+00 : f32
    %14 = vector.broadcast %cst_7 : f32 to vector<10x8xf32>
    %15 = vector.extract_strided_slice %12 {offsets = [0, 0], sizes = [10, 256], strides = [1, 1]} : vector<10x2048xf32> to vector<10x256xf32>
    %cst_8 = arith.constant dense<0.000000e+00> : vector<10xf32>
    %16 = vector.multi_reduction <add>, %15, %cst_8 [1] : vector<10x256xf32> to vector<10xf32>
    %17 = vector.shape_cast %16 : vector<10xf32> to vector<10x1xf32>
    %c0_i32 = arith.constant 0 : i32
    %18 = vector.broadcast %c0_i32 : i32 to vector<10x8xi32>
    %19 = arith.cmpi eq, %13, %18 : vector<10x8xi32>
    %cst_9 = arith.constant 0.000000e+00 : f32
    %20 = vector.shape_cast %17 : vector<10x1xf32> to vector<10x1xf32>
    %21 = vector.broadcast %20 : vector<10x1xf32> to vector<10x8xf32>
    %22 = vector.broadcast %cst_9 : f32 to vector<10x8xf32>
    %23 = arith.select %19, %21, %22 : vector<10x8xi1>, vector<10x8xf32>
    %24 = arith.addf %14, %23 : vector<10x8xf32>
    %25 = vector.extract_strided_slice %12 {offsets = [0, 256], sizes = [10, 256], strides = [1, 1]} : vector<10x2048xf32> to vector<10x256xf32>
    %cst_10 = arith.constant dense<0.000000e+00> : vector<10xf32>
    %26 = vector.multi_reduction <add>, %25, %cst_10 [1] : vector<10x256xf32> to vector<10xf32>
    %27 = vector.shape_cast %26 : vector<10xf32> to vector<10x1xf32>
    %c1_i32 = arith.constant 1 : i32
    %28 = vector.broadcast %c1_i32 : i32 to vector<10x8xi32>
    %29 = arith.cmpi eq, %13, %28 : vector<10x8xi32>
    %cst_11 = arith.constant 0.000000e+00 : f32
    %30 = vector.shape_cast %27 : vector<10x1xf32> to vector<10x1xf32>
    %31 = vector.broadcast %30 : vector<10x1xf32> to vector<10x8xf32>
    %32 = vector.broadcast %cst_11 : f32 to vector<10x8xf32>
    %33 = arith.select %29, %31, %32 : vector<10x8xi1>, vector<10x8xf32>
    %34 = arith.addf %24, %33 : vector<10x8xf32>
    %35 = vector.extract_strided_slice %12 {offsets = [0, 512], sizes = [10, 256], strides = [1, 1]} : vector<10x2048xf32> to vector<10x256xf32>
    %cst_12 = arith.constant dense<0.000000e+00> : vector<10xf32>
    %36 = vector.multi_reduction <add>, %35, %cst_12 [1] : vector<10x256xf32> to vector<10xf32>
    %37 = vector.shape_cast %36 : vector<10xf32> to vector<10x1xf32>
    %c2_i32 = arith.constant 2 : i32
    %38 = vector.broadcast %c2_i32 : i32 to vector<10x8xi32>
    %39 = arith.cmpi eq, %13, %38 : vector<10x8xi32>
    %cst_13 = arith.constant 0.000000e+00 : f32
    %40 = vector.shape_cast %37 : vector<10x1xf32> to vector<10x1xf32>
    %41 = vector.broadcast %40 : vector<10x1xf32> to vector<10x8xf32>
    %42 = vector.broadcast %cst_13 : f32 to vector<10x8xf32>
    %43 = arith.select %39, %41, %42 : vector<10x8xi1>, vector<10x8xf32>
    %44 = arith.addf %34, %43 : vector<10x8xf32>
    %45 = vector.extract_strided_slice %12 {offsets = [0, 768], sizes = [10, 256], strides = [1, 1]} : vector<10x2048xf32> to vector<10x256xf32>
    %cst_14 = arith.constant dense<0.000000e+00> : vector<10xf32>
    %46 = vector.multi_reduction <add>, %45, %cst_14 [1] : vector<10x256xf32> to vector<10xf32>
    %47 = vector.shape_cast %46 : vector<10xf32> to vector<10x1xf32>
    %c3_i32 = arith.constant 3 : i32
    %48 = vector.broadcast %c3_i32 : i32 to vector<10x8xi32>
    %49 = arith.cmpi eq, %13, %48 : vector<10x8xi32>
    %cst_15 = arith.constant 0.000000e+00 : f32
    %50 = vector.shape_cast %47 : vector<10x1xf32> to vector<10x1xf32>
    %51 = vector.broadcast %50 : vector<10x1xf32> to vector<10x8xf32>
    %52 = vector.broadcast %cst_15 : f32 to vector<10x8xf32>
    %53 = arith.select %49, %51, %52 : vector<10x8xi1>, vector<10x8xf32>
    %54 = arith.addf %44, %53 : vector<10x8xf32>
    %55 = vector.extract_strided_slice %12 {offsets = [0, 1024], sizes = [10, 256], strides = [1, 1]} : vector<10x2048xf32> to vector<10x256xf32>
    %cst_16 = arith.constant dense<0.000000e+00> : vector<10xf32>
    %56 = vector.multi_reduction <add>, %55, %cst_16 [1] : vector<10x256xf32> to vector<10xf32>
    %57 = vector.shape_cast %56 : vector<10xf32> to vector<10x1xf32>
    %c4_i32 = arith.constant 4 : i32
    %58 = vector.broadcast %c4_i32 : i32 to vector<10x8xi32>
    %59 = arith.cmpi eq, %13, %58 : vector<10x8xi32>
    %cst_17 = arith.constant 0.000000e+00 : f32
    %60 = vector.shape_cast %57 : vector<10x1xf32> to vector<10x1xf32>
    %61 = vector.broadcast %60 : vector<10x1xf32> to vector<10x8xf32>
    %62 = vector.broadcast %cst_17 : f32 to vector<10x8xf32>
    %63 = arith.select %59, %61, %62 : vector<10x8xi1>, vector<10x8xf32>
    %64 = arith.addf %54, %63 : vector<10x8xf32>
    %65 = vector.extract_strided_slice %12 {offsets = [0, 1280], sizes = [10, 256], strides = [1, 1]} : vector<10x2048xf32> to vector<10x256xf32>
    %cst_18 = arith.constant dense<0.000000e+00> : vector<10xf32>
    %66 = vector.multi_reduction <add>, %65, %cst_18 [1] : vector<10x256xf32> to vector<10xf32>
    %67 = vector.shape_cast %66 : vector<10xf32> to vector<10x1xf32>
    %c5_i32 = arith.constant 5 : i32
    %68 = vector.broadcast %c5_i32 : i32 to vector<10x8xi32>
    %69 = arith.cmpi eq, %13, %68 : vector<10x8xi32>
    %cst_19 = arith.constant 0.000000e+00 : f32
    %70 = vector.shape_cast %67 : vector<10x1xf32> to vector<10x1xf32>
    %71 = vector.broadcast %70 : vector<10x1xf32> to vector<10x8xf32>
    %72 = vector.broadcast %cst_19 : f32 to vector<10x8xf32>
    %73 = arith.select %69, %71, %72 : vector<10x8xi1>, vector<10x8xf32>
    %74 = arith.addf %64, %73 : vector<10x8xf32>
    %75 = vector.extract_strided_slice %12 {offsets = [0, 1536], sizes = [10, 256], strides = [1, 1]} : vector<10x2048xf32> to vector<10x256xf32>
    %cst_20 = arith.constant dense<0.000000e+00> : vector<10xf32>
    %76 = vector.multi_reduction <add>, %75, %cst_20 [1] : vector<10x256xf32> to vector<10xf32>
    %77 = vector.shape_cast %76 : vector<10xf32> to vector<10x1xf32>
    %c6_i32 = arith.constant 6 : i32
    %78 = vector.broadcast %c6_i32 : i32 to vector<10x8xi32>
    %79 = arith.cmpi eq, %13, %78 : vector<10x8xi32>
    %cst_21 = arith.constant 0.000000e+00 : f32
    %80 = vector.shape_cast %77 : vector<10x1xf32> to vector<10x1xf32>
    %81 = vector.broadcast %80 : vector<10x1xf32> to vector<10x8xf32>
    %82 = vector.broadcast %cst_21 : f32 to vector<10x8xf32>
    %83 = arith.select %79, %81, %82 : vector<10x8xi1>, vector<10x8xf32>
    %84 = arith.addf %74, %83 : vector<10x8xf32>
    %85 = vector.extract_strided_slice %12 {offsets = [0, 1792], sizes = [10, 256], strides = [1, 1]} : vector<10x2048xf32> to vector<10x256xf32>
    %cst_22 = arith.constant dense<0.000000e+00> : vector<10xf32>
    %86 = vector.multi_reduction <add>, %85, %cst_22 [1] : vector<10x256xf32> to vector<10xf32>
    %87 = vector.shape_cast %86 : vector<10xf32> to vector<10x1xf32>
    %c7_i32 = arith.constant 7 : i32
    %88 = vector.broadcast %c7_i32 : i32 to vector<10x8xi32>
    %89 = arith.cmpi eq, %13, %88 : vector<10x8xi32>
    %cst_23 = arith.constant 0.000000e+00 : f32
    %90 = vector.shape_cast %87 : vector<10x1xf32> to vector<10x1xf32>
    %91 = vector.broadcast %90 : vector<10x1xf32> to vector<10x8xf32>
    %92 = vector.broadcast %cst_23 : f32 to vector<10x8xf32>
    %93 = arith.select %89, %91, %92 : vector<10x8xi1>, vector<10x8xf32>
    %94 = arith.addf %84, %93 : vector<10x8xf32>
    %cst_24 = arith.constant 3.906250e-03 : f32
    %95 = vector.broadcast %cst_24 : f32 to vector<10x8xf32>
    %96 = arith.mulf %94, %95 : vector<10x8xf32>
    %97 = vector.broadcast %11 : vector<10x1xf32> to vector<10x8xf32>
    %98 = arith.addf %96, %97 : vector<10x8xf32>
    %c0_25 = arith.constant 0 : index
    %c0_26 = arith.constant 0 : index
    %c0_27 = arith.constant 0 : index
    %99 = vector.load %arg4[%c0_25, %c0_26, %c0_27] : memref<1x10x8xf32, #tpu.memory_space<vmem>>, vector<1x10x8xf32>
    %100 = vector.shape_cast %99 : vector<1x10x8xf32> to vector<10x8xf32>
    %101 = vector.shape_cast %98 : vector<10x8xf32> to vector<1x10x8xf32>
    tpu.vector_store %arg4[%c0_25, %c0_26, %c0_27], %101 {strides = array<i32>} : memref<1x10x8xf32, #tpu.memory_space<vmem>>, vector<1x10x8xf32>,
    return
  }
  func.func @transform_0(%arg0: i32) -> (i32, i32) {
    %c0_i32 = arith.constant 0 : i32
    %c0_i32_0 = arith.constant 0 : i32
    return %c0_i32, %arg0 : i32, i32
  }
  func.func @transform_1(%arg0: i32) -> (i32, i32) {
    %c0_i32 = arith.constant 0 : i32
    %c0_i32_0 = arith.constant 0 : i32
    %c0_i32_1 = arith.constant 0 : i32
    return %c0_i32, %c0_i32_0 : i32, i32
  }
  func.func @transform_2(%arg0: i32) -> (i32, i32) {
    %c0_i32 = arith.constant 0 : i32
    %c0_i32_0 = arith.constant 0 : i32
    %c0_i32_1 = arith.constant 0 : i32
    return %c0_i32, %c0_i32_0 : i32, i32
  }
  func.func @transform_3(%arg0: i32) -> (i32, i32, i32) {
    %c0_i32 = arith.constant 0 : i32
    %c0_i32_0 = arith.constant 0 : i32
    %c0_i32_1 = arith.constant 0 : i32
    return %arg0, %c0_i32, %c0_i32_0 : i32, i32, i32
  }
}

</mosaic_0001>

<bundles_post_ra>
// kernel: ensemble_forward.1
= control target key start
LH: loop header
LB: loop body
LE: loop exit
PB: predicated region body
PF: predicated region fallthrough
CT: control target
= control target key end

     0   :  { %s1539_s12 = smov 0   ;;  %s1541_s13 = smov 0   ;;  %s2018_s0 = inlined_call_operand.vmem [shape: f32[36,8192], index: 0, kind: input, shape index: {}]   ;;  %s2019_s1 = inlined_call_operand.vmem [shape: f32[8,37], index: 1, kind: input, shape index: {}]   ;;  %s2020_s2 = inlined_call_operand.vmem [shape: f32[10,9], index: 2, kind: input, shape index: {}]   ;;  %s2021_s3 = inlined_call_operand.vmem [shape: f32[4,10,8], index: 3, kind: output, shape index: {}]  }
   0x1   :  { %s1543_s14 = smov 0  }
   0x2 LB: > { %s1384_s15 = sadd.s32 4294967295, %s1515_s14   ;;  %s1556_s16 = sadd.s32 1, %s1515_s14   ;;  %s1515_s14 = sphi %s1543_s14, %s2024_s14   ;;  %s1511_s13 = sphi %s1541_s13, %s2023_s13   ;;  %s1507_s12 = sphi %s1539_s12, %s2022_s12  }
   0x3   : > { %s17_s17 = ssub.s32 %s1515_s14, %s1556_s16  ;;  %s20_s18 = sadd.s32 1, %s1511_s13 }
   0x4   : > { %p18_p0 = scmp.eq.s32.totalorder %s17_s17, 0  ;;  %p27_p1 = scmp.ne.s32.totalorder %s1511_s13, %s1507_s12 }
   0x5   : > { %p28_p2 = scmp.eq.s32.totalorder %s1515_s14, 0  ;;  %p1387_p4 = scmp.ge.s32.totalorder %s1515_s14, 4 }
   0x6   : > { %s1565_s19 = scalar_select %p18_p0, %s1511_s13, %s20_s18  }
   0x7   : > { %p29_p3 = por %p28_p2, %p27_p1  ;;  %127 = sbr.rel (%p1387_p4) target bundleno = 96 (0x60), region = 24 }
   0xc   : > { %130 = sbr.rel (!%p29_p3) target bundleno = 96 (0x60), region = 28  ;;  %s132_s20 = sand.u32 (%p29_p3), 1, %s1511_s13  }
   0xd   : > { %s1459_s21 = sshll.u32 (%p29_p3), %s1515_s14, 7  ;;  %s1461_s22 = smul.u32 (%p29_p3), 640, %s132_s20 }
   0xe   : > { %s1573_s25 = scalar_lea.vmem (%p29_p3), %s2018_s0, %s1459_s21 }
   0xf   : > { %v150_v0 = vld [vmem:[%s1573_s25] sm:$0xff] (%p29_p3)  ;;  %v152_v1 = vld [vmem:[%s1573_s25 + $0x8] sm:$0xff] (%p29_p3)  ;;  %v154_v2 = vld [vmem:[%s1573_s25 + $0x10] sm:$0xff] (%p29_p3)  ;;  %s1578_s26 = scalar_lea.vmem (%p29_p3), [#allocation2], %s1461_s22 }
  0x10   : > { %151 = vst [vmem:[%s1578_s26] sm:$0xff] (%p29_p3), %v150_v0  ;;  %v156_v3 = vld [vmem:[%s1573_s25 + $0x18] sm:$0xff] (%p29_p3)  ;;  %v158_v4 = vld [vmem:[%s1573_s25 + $0x20] sm:$0xff] (%p29_p3)  ;;  %v160_v5 = vld [vmem:[%s1573_s25 + $0x28] sm:$0xff] (%p29_p3) }
  0x11   : > { %153 = vst [vmem:[%s1578_s26 + $0x8] sm:$0xff] %v152_v1  ;;  %v162_v6 = vld [vmem:[%s1573_s25 + $0x30] sm:$0xff]  ;;  %v164_v7 = vld [vmem:[%s1573_s25 + $0x38] sm:$0xff]  ;;  %v166_v8 = vld [vmem:[%s1573_s25 + $0x40] sm:$0xff] }
  0x12   : > { %155 = vst [vmem:[%s1578_s26 + $0x10] sm:$0xff] %v154_v2  ;;  %v168_v9 = vld [vmem:[%s1573_s25 + $0x48] sm:$0xff]  ;;  %v170_v10 = vld [vmem:[%s1573_s25 + $0x50] sm:$0xff]  ;;  %v172_v11 = vld [vmem:[%s1573_s25 + $0x58] sm:$0xff] }
  0x13   : > { %157 = vst [vmem:[%s1578_s26 + $0x18] sm:$0xff] %v156_v3  ;;  %v174_v12 = vld [vmem:[%s1573_s25 + $0x60] sm:$0xff]  ;;  %v176_v13 = vld [vmem:[%s1573_s25 + $0x68] sm:$0xff]  ;;  %v178_v14 = vld [vmem:[%s1573_s25 + $0x70] sm:$0xff] }
  0x14   : > { %159 = vst [vmem:[%s1578_s26 + $0x20] sm:$0xff] %v158_v4  ;;  %v180_v15 = vld [vmem:[%s1573_s25 + $0x78] sm:$0xff]  ;;  %v182_v16 = vld [vmem:[%s1573_s25 + $0x200] sm:$0xff]  ;;  %v184_v17 = vld [vmem:[%s1573_s25 + $0x208] sm:$0xff] }
  0x15   : > { %161 = vst [vmem:[%s1578_s26 + $0x28] sm:$0xff] %v160_v5  ;;  %v186_v18 = vld [vmem:[%s1573_s25 + $0x210] sm:$0xff]  ;;  %v188_v19 = vld [vmem:[%s1573_s25 + $0x218] sm:$0xff]  ;;  %v190_v20 = vld [vmem:[%s1573_s25 + $0x220] sm:$0xff] }
  0x16   : > { %163 = vst [vmem:[%s1578_s26 + $0x30] sm:$0xff] %v162_v6  ;;  %v192_v21 = vld [vmem:[%s1573_s25 + $0x228] sm:$0xff]  ;;  %v194_v22 = vld [vmem:[%s1573_s25 + $0x230] sm:$0xff]  ;;  %v196_v23 = vld [vmem:[%s1573_s25 + $0x238] sm:$0xff] }
  0x17   : > { %165 = vst [vmem:[%s1578_s26 + $0x38] sm:$0xff] %v164_v7  ;;  %v198_v24 = vld [vmem:[%s1573_s25 + $0x240] sm:$0xff]  ;;  %v200_v25 = vld [vmem:[%s1573_s25 + $0x248] sm:$0xff]  ;;  %v202_v26 = vld [vmem:[%s1573_s25 + $0x250] sm:$0xff] }
  0x18   : > { %167 = vst [vmem:[%s1578_s26 + $0x40] sm:$0xff] %v166_v8  ;;  %v204_v27 = vld [vmem:[%s1573_s25 + $0x258] sm:$0xff]  ;;  %v206_v28 = vld [vmem:[%s1573_s25 + $0x260] sm:$0xff]  ;;  %v208_v29 = vld [vmem:[%s1573_s25 + $0x268] sm:$0xff] }
  0x19   : > { %169 = vst [vmem:[%s1578_s26 + $0x48] sm:$0xff] %v168_v9  ;;  %v210_v30 = vld [vmem:[%s1573_s25 + $0x270] sm:$0xff]  ;;  %v212_v31 = vld [vmem:[%s1573_s25 + $0x278] sm:$0xff]  ;;  %v214_v32 = vld [vmem:[%s1573_s25 + $0x400] sm:$0xff] }
  0x1a   : > { %171 = vst [vmem:[%s1578_s26 + $0x50] sm:$0xff] %v170_v10  ;;  %v216_v33 = vld [vmem:[%s1573_s25 + $0x408] sm:$0xff]  ;;  %v218_v34 = vld [vmem:[%s1573_s25 + $0x410] sm:$0xff]  ;;  %v220_v35 = vld [vmem:[%s1573_s25 + $0x418] sm:$0xff] }
  0x1b   : > { %173 = vst [vmem:[%s1578_s26 + $0x58] sm:$0xff] %v172_v11  ;;  %v222_v36 = vld [vmem:[%s1573_s25 + $0x420] sm:$0xff]  ;;  %v224_v37 = vld [vmem:[%s1573_s25 + $0x428] sm:$0xff]  ;;  %v226_v38 = vld [vmem:[%s1573_s25 + $0x430] sm:$0xff] }
  0x1c   : > { %175 = vst [vmem:[%s1578_s26 + $0x60] sm:$0xff] %v174_v12  ;;  %v228_v39 = vld [vmem:[%s1573_s25 + $0x438] sm:$0xff]  ;;  %v230_v40 = vld [vmem:[%s1573_s25 + $0x440] sm:$0xff]  ;;  %v232_v41 = vld [vmem:[%s1573_s25 + $0x448] sm:$0xff] }
  0x1d   : > { %177 = vst [vmem:[%s1578_s26 + $0x68] sm:$0xff] %v176_v13  ;;  %v234_v42 = vld [vmem:[%s1573_s25 + $0x450] sm:$0xff]  ;;  %v236_v43 = vld [vmem:[%s1573_s25 + $0x458] sm:$0xff]  ;;  %v238_v44 = vld [vmem:[%s1573_s25 + $0x460] sm:$0xff] }
  0x1e   : > { %179 = vst [vmem:[%s1578_s26 + $0x70] sm:$0xff] %v178_v14  ;;  %v240_v45 = vld [vmem:[%s1573_s25 + $0x468] sm:$0xff]  ;;  %v242_v46 = vld [vmem:[%s1573_s25 + $0x470] sm:$0xff]  ;;  %v244_v47 = vld [vmem:[%s1573_s25 + $0x478] sm:$0xff] }
  0x1f   : > { %181 = vst [vmem:[%s1578_s26 + $0x78] sm:$0xff] %v180_v15  ;;  %v246_v48 = vld [vmem:[%s1573_s25 + $0x600] sm:$0xff]  ;;  %v248_v49 = vld [vmem:[%s1573_s25 + $0x608] sm:$0xff]  ;;  %v250_v50 = vld [vmem:[%s1573_s25 + $0x610] sm:$0xff] }
  0x20   : > { %183 = vst [vmem:[%s1578_s26 + $0x80] sm:$0xff] %v182_v16  ;;  %v252_v51 = vld [vmem:[%s1573_s25 + $0x618] sm:$0xff]  ;;  %v254_v52 = vld [vmem:[%s1573_s25 + $0x620] sm:$0xff]  ;;  %v256_v53 = vld [vmem:[%s1573_s25 + $0x628] sm:$0xff] }
  0x21   : > { %185 = vst [vmem:[%s1578_s26 + $0x88] sm:$0xff] %v184_v17  ;;  %v258_v54 = vld [vmem:[%s1573_s25 + $0x630] sm:$0xff]  ;;  %v260_v55 = vld [vmem:[%s1573_s25 + $0x638] sm:$0xff]  ;;  %v262_v56 = vld [vmem:[%s1573_s25 + $0x640] sm:$0xff] }
  0x22   : > { %187 = vst [vmem:[%s1578_s26 + $0x90] sm:$0xff] %v186_v18  ;;  %v264_v57 = vld [vmem:[%s1573_s25 + $0x648] sm:$0xff]  ;;  %v266_v58 = vld [vmem:[%s1573_s25 + $0x650] sm:$0xff]  ;;  %v268_v59 = vld [vmem:[%s1573_s25 + $0x658] sm:$0xff] }
  0x23   : > { %189 = vst [vmem:[%s1578_s26 + $0x98] sm:$0xff] %v188_v19  ;;  %v270_v60 = vld [vmem:[%s1573_s25 + $0x660] sm:$0xff]  ;;  %v272_v61 = vld [vmem:[%s1573_s25 + $0x668] sm:$0xff]  ;;  %v274_v62 = vld [vmem:[%s1573_s25 + $0x670] sm:$0xff] }
  0x24   : > { %191 = vst [vmem:[%s1578_s26 + $0xa0] sm:$0xff] %v190_v20  ;;  %v276_v63 = vld [vmem:[%s1573_s25 + $0x678] sm:$0xff]  ;;  %v278_v0 = vld [vmem:[%s1573_s25 + $0x800] sm:$0xff]  ;;  %v280_v1 = vld [vmem:[%s1573_s25 + $0x808] sm:$0xff] }
  0x25   : > { %193 = vst [vmem:[%s1578_s26 + $0xa8] sm:$0xff] %v192_v21  ;;  %v282_v2 = vld [vmem:[%s1573_s25 + $0x810] sm:$0xff]  ;;  %v284_v3 = vld [vmem:[%s1573_s25 + $0x818] sm:$0xff]  ;;  %v286_v4 = vld [vmem:[%s1573_s25 + $0x820] sm:$0xff] }
  0x26   : > { %195 = vst [vmem:[%s1578_s26 + $0xb0] sm:$0xff] %v194_v22  ;;  %v288_v5 = vld [vmem:[%s1573_s25 + $0x828] sm:$0xff]  ;;  %v290_v6 = vld [vmem:[%s1573_s25 + $0x830] sm:$0xff]  ;;  %v292_v7 = vld [vmem:[%s1573_s25 + $0x838] sm:$0xff] }
  0x27   : > { %197 = vst [vmem:[%s1578_s26 + $0xb8] sm:$0xff] %v196_v23  ;;  %v294_v8 = vld [vmem:[%s1573_s25 + $0x840] sm:$0xff]  ;;  %v296_v9 = vld [vmem:[%s1573_s25 + $0x848] sm:$0xff]  ;;  %v298_v10 = vld [vmem:[%s1573_s25 + $0x850] sm:$0xff] }
  0x28   : > { %199 = vst [vmem:[%s1578_s26 + $0xc0] sm:$0xff] %v198_v24  ;;  %v300_v11 = vld [vmem:[%s1573_s25 + $0x858] sm:$0xff]  ;;  %v302_v12 = vld [vmem:[%s1573_s25 + $0x860] sm:$0xff]  ;;  %v304_v13 = vld [vmem:[%s1573_s25 + $0x868] sm:$0xff] }
  0x29   : > { %201 = vst [vmem:[%s1578_s26 + $0xc8] sm:$0xff] %v200_v25  ;;  %v306_v14 = vld [vmem:[%s1573_s25 + $0x870] sm:$0xff]  ;;  %v308_v15 = vld [vmem:[%s1573_s25 + $0x878] sm:$0xff] }
  0x2a   : > { %203 = vst [vmem:[%s1578_s26 + $0xd0] sm:$0xff] %v202_v26 }
  0x2b   : > { %205 = vst [vmem:[%s1578_s26 + $0xd8] sm:$0xff] %v204_v27 }
  0x2c   : > { %207 = vst [vmem:[%s1578_s26 + $0xe0] sm:$0xff] %v206_v28 }
  0x2d   : > { %209 = vst [vmem:[%s1578_s26 + $0xe8] sm:$0xff] %v208_v29 }
  0x2e   : > { %211 = vst [vmem:[%s1578_s26 + $0xf0] sm:$0xff] %v210_v30 }
  0x2f   : > { %213 = vst [vmem:[%s1578_s26 + $0xf8] sm:$0xff] %v212_v31 }
  0x30   : > { %215 = vst [vmem:[%s1578_s26 + $0x100] sm:$0xff] %v214_v32 }
  0x31   : > { %217 = vst [vmem:[%s1578_s26 + $0x108] sm:$0xff] %v216_v33 }
  0x32   : > { %219 = vst [vmem:[%s1578_s26 + $0x110] sm:$0xff] %v218_v34 }
  0x33   : > { %221 = vst [vmem:[%s1578_s26 + $0x118] sm:$0xff] %v220_v35 }
  0x34   : > { %223 = vst [vmem:[%s1578_s26 + $0x120] sm:$0xff] %v222_v36 }
  0x35   : > { %225 = vst [vmem:[%s1578_s26 + $0x128] sm:$0xff] %v224_v37 }
  0x36   : > { %227 = vst [vmem:[%s1578_s26 + $0x130] sm:$0xff] %v226_v38 }
  0x37   : > { %229 = vst [vmem:[%s1578_s26 + $0x138] sm:$0xff] %v228_v39 }
  0x38   : > { %231 = vst [vmem:[%s1578_s26 + $0x140] sm:$0xff] %v230_v40 }
  0x39   : > { %233 = vst [vmem:[%s1578_s26 + $0x148] sm:$0xff] %v232_v41 }
  0x3a   : > { %235 = vst [vmem:[%s1578_s26 + $0x150] sm:$0xff] %v234_v42 }
  0x3b   : > { %237 = vst [vmem:[%s1578_s26 + $0x158] sm:$0xff] %v236_v43 }
  0x3c   : > { %239 = vst [vmem:[%s1578_s26 + $0x160] sm:$0xff] %v238_v44 }
  0x3d   : > { %241 = vst [vmem:[%s1578_s26 + $0x168] sm:$0xff] %v240_v45 }
  0x3e   : > { %243 = vst [vmem:[%s1578_s26 + $0x170] sm:$0xff] %v242_v46 }
  0x3f   : > { %245 = vst [vmem:[%s1578_s26 + $0x178] sm:$0xff] %v244_v47 }
  0x40   : > { %247 = vst [vmem:[%s1578_s26 + $0x180] sm:$0xff] %v246_v48 }
  0x41   : > { %249 = vst [vmem:[%s1578_s26 + $0x188] sm:$0xff] %v248_v49 }
  0x42   : > { %251 = vst [vmem:[%s1578_s26 + $0x190] sm:$0xff] %v250_v50 }
  0x43   : > { %253 = vst [vmem:[%s1578_s26 + $0x198] sm:$0xff] %v252_v51 }
  0x44   : > { %255 = vst [vmem:[%s1578_s26 + $0x1a0] sm:$0xff] %v254_v52 }
  0x45   : > { %257 = vst [vmem:[%s1578_s26 + $0x1a8] sm:$0xff] %v256_v53 }
  0x46   : > { %259 = vst [vmem:[%s1578_s26 + $0x1b0] sm:$0xff] %v258_v54 }
  0x47   : > { %261 = vst [vmem:[%s1578_s26 + $0x1b8] sm:$0xff] %v260_v55 }
  0x48   : > { %263 = vst [vmem:[%s1578_s26 + $0x1c0] sm:$0xff] %v262_v56 }
  0x49   : > { %265 = vst [vmem:[%s1578_s26 + $0x1c8] sm:$0xff] %v264_v57 }
  0x4a   : > { %267 = vst [vmem:[%s1578_s26 + $0x1d0] sm:$0xff] %v266_v58 }
  0x4b   : > { %269 = vst [vmem:[%s1578_s26 + $0x1d8] sm:$0xff] %v268_v59 }
  0x4c   : > { %271 = vst [vmem:[%s1578_s26 + $0x1e0] sm:$0xff] %v270_v60 }
  0x4d   : > { %273 = vst [vmem:[%s1578_s26 + $0x1e8] sm:$0xff] %v272_v61 }
  0x4e   : > { %275 = vst [vmem:[%s1578_s26 + $0x1f0] sm:$0xff] %v274_v62 }
  0x4f   : > { %277 = vst [vmem:[%s1578_s26 + $0x1f8] sm:$0xff] %v276_v63 }
  0x50   : > { %279 = vst [vmem:[%s1578_s26 + $0x200] sm:$0xff] %v278_v0 }
  0x51   : > { %281 = vst [vmem:[%s1578_s26 + $0x208] sm:$0xff] %v280_v1 }
  0x52   : > { %283 = vst [vmem:[%s1578_s26 + $0x210] sm:$0xff] %v282_v2 }
  0x53   : > { %285 = vst [vmem:[%s1578_s26 + $0x218] sm:$0xff] %v284_v3 }
  0x54   : > { %287 = vst [vmem:[%s1578_s26 + $0x220] sm:$0xff] %v286_v4 }
  0x55   : > { %289 = vst [vmem:[%s1578_s26 + $0x228] sm:$0xff] %v288_v5 }
  0x56   : > { %291 = vst [vmem:[%s1578_s26 + $0x230] sm:$0xff] %v290_v6 }
  0x57   : > { %293 = vst [vmem:[%s1578_s26 + $0x238] sm:$0xff] %v292_v7 }
  0x58   : > { %295 = vst [vmem:[%s1578_s26 + $0x240] sm:$0xff] %v294_v8 }
  0x59   : > { %297 = vst [vmem:[%s1578_s26 + $0x248] sm:$0xff] %v296_v9 }
  0x5a   : > { %299 = vst [vmem:[%s1578_s26 + $0x250] sm:$0xff] %v298_v10 }
  0x5b   : > { %301 = vst [vmem:[%s1578_s26 + $0x258] sm:$0xff] %v300_v11 }
  0x5c   : > { %303 = vst [vmem:[%s1578_s26 + $0x260] sm:$0xff] %v302_v12 }
  0x5d   : > { %305 = vst [vmem:[%s1578_s26 + $0x268] sm:$0xff] %v304_v13 }
  0x5e   : > { %307 = vst [vmem:[%s1578_s26 + $0x270] sm:$0xff] %v306_v14 }
  0x5f   : > { %309 = vst [vmem:[%s1578_s26 + $0x278] sm:$0xff] %v308_v15 }
  0x60 PF: > { %p1390_p5 = scmp.ge.s32.totalorder %s1515_s14, 1  ;;  %p314_p6 = scmp.lt.s32.totalorder %s1515_s14, 5 }
  0x62   : > { %p315_p7 = pnand %p1390_p5, %p314_p6 }
  0x63   : > { %s321_s27 = sand.u32 (!%p315_p7), 1, %s1507_s12   ;;  %p345_p8 = scmp.lt.s32.totalorder (!%p315_p7), %s1384_s15, 3 }
  0x64   : > { %318 = sbr.rel (%p315_p7) target bundleno = 582 (0x246), region = 51 }
  0x65   : > { %s1462_s28 = smul.u32 (!%p315_p7), 640, %s321_s27 }
  0x67   : > { %s1746_s4 = scalar_lea.vmem (!%p315_p7), [#allocation2], %s1462_s28 }
  0x69   : > { %v1743_v16 = vld [vmem:[%s2019_s1] sm:$0xff]  ;;  %v1517_v17 = vmov 36   ;;  %vm439_vm0 = vcmask 1043456   ;;  %v416_v19 = vld [vmem:[%s1746_s4 + $0x208] sm:$0xf]  ;;  %v401_v24 = vld [vmem:[%s1746_s4 + $0x190] sm:$0xff] }
  0x6a   : > { %1489 = vset.pattern.permute.xlu0 %v1517_v17  ;;  %v415_v18 = vld [vmem:[%s1746_s4 + $0x200] sm:$0xf]  ;;  %v417_v20 = vld [vmem:[%s1746_s4 + $0x210] sm:$0xf]  ;;  %1395 = vmatpush.msk.msra.mxu1 %vm439_vm0, %v416_v19  ;;  %v418_v21 = vld [vmem:[%s1746_s4 + $0x218] sm:$0xf] }
  0x6b   : > { %433 = vperm.xlu0 %1489, %v1743_v16   ;;  %1393 = vmatpush.msk.msra.mxu0 %vm439_vm0, %v415_v18  ;;  %v399_v22 = vld [vmem:[%s1746_s4 + $0x180] sm:$0xff]  ;;  %v400_v23 = vld [vmem:[%s1746_s4 + $0x188] sm:$0xff]  ;;  %v402_v25 = vld [vmem:[%s1746_s4 + $0x198] sm:$0xff]  ;;  %vm436_vm1 = vcmask 293888   ;;  %vm826_vm2 = vcmask 64512   ;;  %vm1206_vm3 = vcmask 1041408  }
  0x6c   : > { %1397 = vmatpush.msk.msra.mxu2 %vm439_vm0, %v417_v20  ;;  %1399 = vmatpush.msk.msra.mxu3 %vm439_vm0, %v418_v21  ;;  %v383_v26 = vld [vmem:[%s1746_s4 + $0x100] sm:$0xff]  ;;  %v384_v27 = vld [vmem:[%s1746_s4 + $0x108] sm:$0xff]  ;;  %v385_v28 = vld [vmem:[%s1746_s4 + $0x110] sm:$0xff]  ;;  %s2026_s15 = smov (!%p345_p8, %s1384_s15), 3  ;;  %vm1321_vm12 = vcmask 58368  }
  0x6d   : > { %500 = vmatpush.msra.mxu0 %v399_v22  ;;  %520 = vmatpush.msra.mxu1 %v400_v23  ;;  %v386_v29 = vld [vmem:[%s1746_s4 + $0x118] sm:$0xff]  ;;  %v367_v30 = vld [vmem:[%s1746_s4 + $0x80] sm:$0xff]  ;;  %v368_v31 = vld [vmem:[%s1746_s4 + $0x88] sm:$0xff]  ;;  %s1460_s9 = sshll.u32 %s2026_s15, 4 }
  0x6e   : > { %540 = vmatpush.msra.mxu2 %v401_v24  ;;  %560 = vmatpush.msra.mxu3 %v402_v25  ;;  %v369_v32 = vld [vmem:[%s1746_s4 + $0x90] sm:$0xff]  ;;  %v370_v33 = vld [vmem:[%s1746_s4 + $0x98] sm:$0xff]  ;;  %v351_v34 = vld [vmem:[%s1746_s4] sm:$0xff]  ;;  %s349_s12 = scalar_lea.vmem %s2021_s3, %s1460_s9 }
  0x6f   : > { %501 = vmatpush.msra.mxu0 %v383_v26  ;;  %521 = vmatpush.msra.mxu1 %v384_v27  ;;  %v352_v35 = vld [vmem:[%s1746_s4 + $0x8] sm:$0xff]  ;;  %v353_v36 = vld [vmem:[%s1746_s4 + $0x10] sm:$0xff]  ;;  %v354_v37 = vld [vmem:[%s1746_s4 + $0x18] sm:$0xff] }
  0x70   : > { %541 = vmatpush.msra.mxu2 %v385_v28  ;;  %561 = vmatpush.msra.mxu3 %v386_v29  ;;  %v419_v38 = vld [vmem:[%s1746_s4 + $0x220] sm:$0xf]  ;;  %v420_v39 = vld [vmem:[%s1746_s4 + $0x228] sm:$0xf]  ;;  %v421_v40 = vld [vmem:[%s1746_s4 + $0x230] sm:$0xf] }
  0x71   : > { %502 = vmatpush.msra.mxu0 %v367_v30  ;;  %522 = vmatpush.msra.mxu1 %v368_v31  ;;  %v422_v41 = vld [vmem:[%s1746_s4 + $0x238] sm:$0xf]  ;;  %v403_v42 = vld [vmem:[%s1746_s4 + $0x1a0] sm:$0xff]  ;;  %v404_v43 = vld [vmem:[%s1746_s4 + $0x1a8] sm:$0xff] }
  0x72   : > { %542 = vmatpush.msra.mxu2 %v369_v32  ;;  %562 = vmatpush.msra.mxu3 %v370_v33  ;;  %v405_v44 = vld [vmem:[%s1746_s4 + $0x1b0] sm:$0xff]  ;;  %v406_v45 = vld [vmem:[%s1746_s4 + $0x1b8] sm:$0xff]  ;;  %v387_v46 = vld [vmem:[%s1746_s4 + $0x120] sm:$0xff] }
  0x73   : > { %503 = vmatpush.msra.mxu0 %v351_v34  ;;  %523 = vmatpush.msra.mxu1 %v352_v35  ;;  %v388_v47 = vld [vmem:[%s1746_s4 + $0x128] sm:$0xff]  ;;  %v389_v48 = vld [vmem:[%s1746_s4 + $0x130] sm:$0xff]  ;;  %v390_v49 = vld [vmem:[%s1746_s4 + $0x138] sm:$0xff] }
  0x74   : > { %543 = vmatpush.msra.mxu2 %v353_v36  ;;  %563 = vmatpush.msra.mxu3 %v354_v37  ;;  %v371_v50 = vld [vmem:[%s1746_s4 + $0xa0] sm:$0xff]  ;;  %v372_v51 = vld [vmem:[%s1746_s4 + $0xa8] sm:$0xff]  ;;  %v373_v52 = vld [vmem:[%s1746_s4 + $0xb0] sm:$0xff] }
  0x75   : > { %1394 = vmatmul.msk.f32.vlgmr.msra.gmra.mxu0 %vm436_vm1, %v1743_v16  ;;  %1396 = vmatmul.msk.f32.vlgmr.msra.gmra.mxu1 %vm436_vm1, %v1743_v16  ;;  %v374_v53 = vld [vmem:[%s1746_s4 + $0xb8] sm:$0xff]  ;;  %v355_v54 = vld [vmem:[%s1746_s4 + $0x20] sm:$0xff]  ;;  %v356_v55 = vld [vmem:[%s1746_s4 + $0x28] sm:$0xff] }
  0x76   : > { %1398 = vmatmul.msk.f32.vlgmr.msra.gmra.mxu2 %vm436_vm1, %v1743_v16  ;;  %1400 = vmatmul.msk.f32.vlgmr.msra.gmra.mxu3 %vm436_vm1, %v1743_v16  ;;  %v357_v56 = vld [vmem:[%s1746_s4 + $0x30] sm:$0xff]  ;;  %v358_v57 = vld [vmem:[%s1746_s4 + $0x38] sm:$0xff]  ;;  %v423_v58 = vld [vmem:[%s1746_s4 + $0x240] sm:$0xf] }
  0x77   : > { %1401 = vmatpush.msk.msrb.mxu0 %vm439_vm0, %v419_v38  ;;  %1403 = vmatpush.msk.msrb.mxu1 %vm439_vm0, %v420_v39  ;;  %v424_v59 = vld [vmem:[%s1746_s4 + $0x248] sm:$0xf]  ;;  %v425_v60 = vld [vmem:[%s1746_s4 + $0x250] sm:$0xf]  ;;  %v426_v61 = vld [vmem:[%s1746_s4 + $0x258] sm:$0xf] }
  0x78   : > { %1405 = vmatpush.msk.msrb.mxu2 %vm439_vm0, %v421_v40  ;;  %1407 = vmatpush.msk.msrb.mxu3 %vm439_vm0, %v422_v41  ;;  %v407_v62 = vld [vmem:[%s1746_s4 + $0x1c0] sm:$0xff]  ;;  %v408_v63 = vld [vmem:[%s1746_s4 + $0x1c8] sm:$0xff]  ;;  %v409_v0 = vld [vmem:[%s1746_s4 + $0x1d0] sm:$0xff] }
  0x79   : > { %580 = vmatpush.msrb.mxu0 %v403_v42  ;;  %600 = vmatpush.msrb.mxu1 %v404_v43  ;;  %v410_v1 = vld [vmem:[%s1746_s4 + $0x1d8] sm:$0xff]  ;;  %v391_v2 = vld [vmem:[%s1746_s4 + $0x140] sm:$0xff]  ;;  %v392_v3 = vld [vmem:[%s1746_s4 + $0x148] sm:$0xff] }
  0x7a   : > { %620 = vmatpush.msrb.mxu2 %v405_v44  ;;  %640 = vmatpush.msrb.mxu3 %v406_v45  ;;  %v393_v4 = vld [vmem:[%s1746_s4 + $0x150] sm:$0xff]  ;;  %v394_v5 = vld [vmem:[%s1746_s4 + $0x158] sm:$0xff]  ;;  %v375_v6 = vld [vmem:[%s1746_s4 + $0xc0] sm:$0xff] }
  0x7b   : > { %581 = vmatpush.msrb.mxu0 %v387_v46  ;;  %601 = vmatpush.msrb.mxu1 %v388_v47  ;;  %v376_v7 = vld [vmem:[%s1746_s4 + $0xc8] sm:$0xff]  ;;  %v377_v8 = vld [vmem:[%s1746_s4 + $0xd0] sm:$0xff]  ;;  %v378_v9 = vld [vmem:[%s1746_s4 + $0xd8] sm:$0xff] }
  0x7c   : > { %621 = vmatpush.msrb.mxu2 %v389_v48  ;;  %641 = vmatpush.msrb.mxu3 %v390_v49  ;;  %v359_v10 = vld [vmem:[%s1746_s4 + $0x40] sm:$0xff]  ;;  %v360_v11 = vld [vmem:[%s1746_s4 + $0x48] sm:$0xff]  ;;  %v361_v12 = vld [vmem:[%s1746_s4 + $0x50] sm:$0xff] }
  0x7d   : > { %582 = vmatpush.msrb.mxu0 %v371_v50  ;;  %602 = vmatpush.msrb.mxu1 %v372_v51  ;;  %v362_v13 = vld [vmem:[%s1746_s4 + $0x58] sm:$0xff]  ;;  %v427_v14 = vld [vmem:[%s1746_s4 + $0x260] sm:$0xf]  ;;  %v428_v15 = vld [vmem:[%s1746_s4 + $0x268] sm:$0xf] }
  0x7e   : > { %622 = vmatpush.msrb.mxu2 %v373_v52  ;;  %642 = vmatpush.msrb.mxu3 %v374_v53  ;;  %v429_v17 = vld [vmem:[%s1746_s4 + $0x270] sm:$0xf]  ;;  %v430_v18 = vld [vmem:[%s1746_s4 + $0x278] sm:$0xf]  ;;  %v411_v19 = vld [vmem:[%s1746_s4 + $0x1e0] sm:$0xff] }
  0x7f   : > { %583 = vmatpush.msrb.mxu0 %v355_v54  ;;  %603 = vmatpush.msrb.mxu1 %v356_v55  ;;  %v412_v20 = vld [vmem:[%s1746_s4 + $0x1e8] sm:$0xff]  ;;  %v413_v21 = vld [vmem:[%s1746_s4 + $0x1f0] sm:$0xff]  ;;  %v414_v22 = vld [vmem:[%s1746_s4 + $0x1f8] sm:$0xff] }
  0x80   : > { %623 = vmatpush.msrb.mxu2 %v357_v56  ;;  %643 = vmatpush.msrb.mxu3 %v358_v57  ;;  %v395_v23 = vld [vmem:[%s1746_s4 + $0x160] sm:$0xff]  ;;  %v396_v24 = vld [vmem:[%s1746_s4 + $0x168] sm:$0xff]  ;;  %v397_v25 = vld [vmem:[%s1746_s4 + $0x170] sm:$0xff] }
  0x81   : > { %1402 = vmatmul.msk.f32.vlgmr.msrb.gmra.mxu0 %vm436_vm1, %v1743_v16  ;;  %1404 = vmatmul.msk.f32.vlgmr.msrb.gmra.mxu1 %vm436_vm1, %v1743_v16  ;;  %v398_v26 = vld [vmem:[%s1746_s4 + $0x178] sm:$0xff]  ;;  %v379_v27 = vld [vmem:[%s1746_s4 + $0xe0] sm:$0xff]  ;;  %v380_v28 = vld [vmem:[%s1746_s4 + $0xe8] sm:$0xff] }
  0x82   : > { %1406 = vmatmul.msk.f32.vlgmr.msrb.gmra.mxu2 %vm436_vm1, %v1743_v16  ;;  %1408 = vmatmul.msk.f32.vlgmr.msrb.gmra.mxu3 %vm436_vm1, %v1743_v16  ;;  %v381_v29 = vld [vmem:[%s1746_s4 + $0xf0] sm:$0xff]  ;;  %v382_v30 = vld [vmem:[%s1746_s4 + $0xf8] sm:$0xff]  ;;  %v363_v31 = vld [vmem:[%s1746_s4 + $0x60] sm:$0xff] }
  0x83   : > { %1409 = vmatpush.msk.msra.mxu0 %vm439_vm0, %v423_v58  ;;  %1411 = vmatpush.msk.msra.mxu1 %vm439_vm0, %v424_v59  ;;  %v364_v32 = vld [vmem:[%s1746_s4 + $0x68] sm:$0xff]  ;;  %v365_v33 = vld [vmem:[%s1746_s4 + $0x70] sm:$0xff]  ;;  %v366_v34 = vld [vmem:[%s1746_s4 + $0x78] sm:$0xff] }
  0x84   : > { %1413 = vmatpush.msk.msra.mxu2 %vm439_vm0, %v425_v60  ;;  %1415 = vmatpush.msk.msra.mxu3 %vm439_vm0, %v426_v61  ;;  %v1883_v42 = vld [vmem:[%s2020_s2] sm:$0xff]  ;;  %v1894_v48 = vld [vmem:[%s2020_s2 + $0x8] sm:$0x3] }
  0x85   : > { %660 = vmatpush.msra.mxu0 %v407_v62  ;;  %680 = vmatpush.msra.mxu1 %v408_v63 }
  0x86   : > { %700 = vmatpush.msra.mxu2 %v409_v0  ;;  %720 = vmatpush.msra.mxu3 %v410_v1 }
  0x87   : > { %661 = vmatpush.msra.mxu0 %v391_v2  ;;  %681 = vmatpush.msra.mxu1 %v392_v3 }
  0x88   : > { %701 = vmatpush.msra.mxu2 %v393_v4  ;;  %721 = vmatpush.msra.mxu3 %v394_v5 }
  0x89   : > { %662 = vmatpush.msra.mxu0 %v375_v6  ;;  %682 = vmatpush.msra.mxu1 %v376_v7 }
  0x8a   : > { %702 = vmatpush.msra.mxu2 %v377_v8  ;;  %722 = vmatpush.msra.mxu3 %v378_v9 }
  0x8b   : > { %663 = vmatpush.msra.mxu0 %v359_v10  ;;  %683 = vmatpush.msra.mxu1 %v360_v11 }
  0x8c   : > { %703 = vmatpush.msra.mxu2 %v361_v12  ;;  %723 = vmatpush.msra.mxu3 %v362_v13 }
  0x8d   : > { %1410 = vmatmul.msk.f32.vlgmr.msra.gmra.mxu0 %vm436_vm1, %v1743_v16  ;;  %1412 = vmatmul.msk.f32.vlgmr.msra.gmra.mxu1 %vm436_vm1, %v1743_v16 }
  0x8e   : > { %1414 = vmatmul.msk.f32.vlgmr.msra.gmra.mxu2 %vm436_vm1, %v1743_v16  ;;  %1416 = vmatmul.msk.f32.vlgmr.msra.gmra.mxu3 %vm436_vm1, %v1743_v16 }
  0x8f   : > { %1417 = vmatpush.msk.msrb.mxu0 %vm439_vm0, %v427_v14  ;;  %1419 = vmatpush.msk.msrb.mxu1 %vm439_vm0, %v428_v15 }
  0x90   : > { %1421 = vmatpush.msk.msrb.mxu2 %vm439_vm0, %v429_v17  ;;  %1423 = vmatpush.msk.msrb.mxu3 %vm439_vm0, %v430_v18 }
  0x91   : > { %740 = vmatpush.msrb.mxu0 %v411_v19  ;;  %760 = vmatpush.msrb.mxu1 %v412_v20 }
  0x92   : > { %780 = vmatpush.msrb.mxu2 %v413_v21  ;;  %800 = vmatpush.msrb.mxu3 %v414_v22 }
  0x93   : > { %741 = vmatpush.msrb.mxu0 %v395_v23  ;;  %761 = vmatpush.msrb.mxu1 %v396_v24 }
  0x94   : > { %781 = vmatpush.msrb.mxu2 %v397_v25  ;;  %801 = vmatpush.msrb.mxu3 %v398_v26 }
  0x95   : > { %742 = vmatpush.msrb.mxu0 %v379_v27  ;;  %762 = vmatpush.msrb.mxu1 %v380_v28 }
  0x96   : > { %782 = vmatpush.msrb.mxu2 %v381_v29  ;;  %802 = vmatpush.msrb.mxu3 %v382_v30 }
  0x97   : > { %743 = vmatpush.msrb.mxu0 %v363_v31  ;;  %763 = vmatpush.msrb.mxu1 %v364_v32 }
  0x98   : > { %783 = vmatpush.msrb.mxu2 %v365_v33  ;;  %803 = vmatpush.msrb.mxu3 %v366_v34 }
  0x99   : > { %1418 = vmatmul.msk.f32.vlgmr.msrb.gmra.mxu0 %vm436_vm1, %v1743_v16  ;;  %1420 = vmatmul.msk.f32.vlgmr.msrb.gmra.mxu1 %vm436_vm1, %v1743_v16 }
  0x9a   : > { %1422 = vmatmul.msk.f32.vlgmr.msrb.gmra.mxu2 %vm436_vm1, %v1743_v16  ;;  %1424 = vmatmul.msk.f32.vlgmr.msrb.gmra.mxu3 %vm436_vm1, %v1743_v16 }
  0xdd   : > { %v1876_v35 = vpop.permute.xlu0 %433 }
  0xf2   : > { %v505_v36 = vpop.f32.mrf.mxu0  ;;  %v525_v37 = vpop.f32.mrf.mxu1 }
  0xf3   : > { %v506_v38 = vadd.f32 %v505_v36, %v1876_v35  ;;  %v526_v39 = vadd.f32 %v525_v37, %v1876_v35 }
  0xf5   : > { %v808_v40 = vmax.f32 %v506_v38, 0.0  ;;  %v809_v41 = vmax.f32 %v526_v39, 0.0 }
  0xf7   : > { %848 = vmatpush.msra.mxu0 %v808_v40  ;;  %871 = vmatpush.msra.mxu1 %v809_v41 }
  0xf8   : > { %1425 = vmatmul.msk.f32.vlgmr.msra.gmra.mxu0 %vm826_vm2, %v1883_v42  ;;  %1427 = vmatmul.msk.f32.vlgmr.msra.gmra.mxu1 %vm826_vm2, %v1883_v42 }
  0xf9   : > { %v545_v16 = vpop.f32.mrf.mxu2  ;;  %v565_v43 = vpop.f32.mrf.mxu3 }
  0xfa   : > { %v546_v44 = vadd.f32 %v545_v16, %v1876_v35  ;;  %v566_v45 = vadd.f32 %v565_v43, %v1876_v35 }
  0xfc   : > { %v810_v46 = vmax.f32 %v546_v44, 0.0  ;;  %v811_v47 = vmax.f32 %v566_v45, 0.0 }
  0xfe   : > { %v585_v49 = vpop.f32.mrf.mxu0  ;;  %v605_v50 = vpop.f32.mrf.mxu1  ;;  %894 = vmatpush.msra.mxu2 %v810_v46  ;;  %917 = vmatpush.msra.mxu3 %v811_v47 }
  0xff   : > { %v586_v51 = vadd.f32 %v585_v49, %v1876_v35  ;;  %v606_v52 = vadd.f32 %v605_v50, %v1876_v35  ;;  %1429 = vmatmul.msk.f32.vlgmr.msra.gmra.mxu2 %vm826_vm2, %v1883_v42  ;;  %1431 = vmatmul.msk.f32.vlgmr.msra.gmra.mxu3 %vm826_vm2, %v1883_v42 }
 0x100   : > { %1426 = vmatmul.msk.f32.gmra.mxu0 %vm826_vm2, %v1894_v48  ;;  %1428 = vmatmul.msk.f32.gmra.mxu1 %vm826_vm2, %v1894_v48 }
 0x101   : > { %v812_v53 = vmax.f32 %v586_v51, 0.0  ;;  %v813_v54 = vmax.f32 %v606_v52, 0.0 }
 0x103   : > { %940 = vmatpush.msrb.mxu0 %v812_v53  ;;  %963 = vmatpush.msrb.mxu1 %v813_v54 }
 0x105   : > { %v625_v55 = vpop.f32.mrf.mxu2  ;;  %v645_v56 = vpop.f32.mrf.mxu3 }
 0x106   : > { %v626_v57 = vadd.f32 %v625_v55, %v1876_v35  ;;  %v646_v58 = vadd.f32 %v645_v56, %v1876_v35 }
 0x107   : > { %1430 = vmatmul.msk.f32.gmra.mxu2 %vm826_vm2, %v1894_v48  ;;  %1432 = vmatmul.msk.f32.gmra.mxu3 %vm826_vm2, %v1894_v48 }
 0x108   : > { %v814_v59 = vmax.f32 %v626_v57, 0.0  ;;  %v815_v60 = vmax.f32 %v646_v58, 0.0  ;;  %1433 = vmatmul.msk.f32.vlgmr.msrb.gmra.mxu0 %vm826_vm2, %v1883_v42  ;;  %1435 = vmatmul.msk.f32.vlgmr.msrb.gmra.mxu1 %vm826_vm2, %v1883_v42 }
 0x10a   : > { %v665_v61 = vpop.f32.mrf.mxu0  ;;  %v685_v62 = vpop.f32.mrf.mxu1  ;;  %986 = vmatpush.msrb.mxu2 %v814_v59  ;;  %1009 = vmatpush.msrb.mxu3 %v815_v60 }
 0x10b   : > { %v666_v63 = vadd.f32 %v665_v61, %v1876_v35  ;;  %v686_v0 = vadd.f32 %v685_v62, %v1876_v35  ;;  %v1518_v62 = vmov 8  }
 0x10c   : > { %1490 = vset.pattern.permute.xlu1 %v1518_v62  ;;  %1491 = vset.pattern.permute.xlu2 %v1518_v62 }
 0x10d   : > { %v816_v1 = vmax.f32 %v666_v63, 0.0  ;;  %v817_v2 = vmax.f32 %v686_v0, 0.0  ;;  %1492 = vset.pattern.permute.xlu0 %v1518_v62 }
 0x10f   : > { %1032 = vmatpush.msra.mxu0 %v816_v1  ;;  %1055 = vmatpush.msra.mxu1 %v817_v2 }
 0x110   : > { %1437 = vmatmul.msk.f32.vlgmr.msrb.gmra.mxu2 %vm826_vm2, %v1883_v42  ;;  %1439 = vmatmul.msk.f32.vlgmr.msrb.gmra.mxu3 %vm826_vm2, %v1883_v42 }
 0x111   : > { %v705_v3 = vpop.f32.mrf.mxu2  ;;  %v725_v4 = vpop.f32.mrf.mxu3  ;;  %1434 = vmatmul.msk.f32.gmra.mxu0 %vm826_vm2, %v1894_v48  ;;  %1436 = vmatmul.msk.f32.gmra.mxu1 %vm826_vm2, %v1894_v48 }
 0x112   : > { %v706_v5 = vadd.f32 %v705_v3, %v1876_v35  ;;  %v726_v6 = vadd.f32 %v725_v4, %v1876_v35 }
 0x114   : > { %v818_v7 = vmax.f32 %v706_v5, 0.0  ;;  %v819_v8 = vmax.f32 %v726_v6, 0.0 }
 0x116   : > { %v745_v9 = vpop.f32.mrf.mxu0  ;;  %v765_v10 = vpop.f32.mrf.mxu1  ;;  %1078 = vmatpush.msra.mxu2 %v818_v7  ;;  %1101 = vmatpush.msra.mxu3 %v819_v8 }
 0x117   : > { %v746_v11 = vadd.f32 %v745_v9, %v1876_v35  ;;  %v766_v12 = vadd.f32 %v765_v10, %v1876_v35 }
 0x118   : > { %1438 = vmatmul.msk.f32.gmra.mxu2 %vm826_vm2, %v1894_v48  ;;  %1440 = vmatmul.msk.f32.gmra.mxu3 %vm826_vm2, %v1894_v48 }
 0x119   : > { %v820_v13 = vmax.f32 %v746_v11, 0.0  ;;  %v821_v14 = vmax.f32 %v766_v12, 0.0  ;;  %1441 = vmatmul.msk.f32.vlgmr.msra.gmra.mxu0 %vm826_vm2, %v1883_v42  ;;  %1443 = vmatmul.msk.f32.vlgmr.msra.gmra.mxu1 %vm826_vm2, %v1883_v42 }
 0x11b   : > { %1124 = vmatpush.msrb.mxu0 %v820_v13  ;;  %1147 = vmatpush.msrb.mxu1 %v821_v14 }
 0x11d   : > { %v785_v15 = vpop.f32.mrf.mxu2  ;;  %v805_v17 = vpop.f32.mrf.mxu3 }
 0x11e   : > { %v786_v18 = vadd.f32 %v785_v15, %v1876_v35  ;;  %v806_v19 = vadd.f32 %v805_v17, %v1876_v35 }
 0x120   : > { %v822_v20 = vmax.f32 %v786_v18, 0.0  ;;  %v823_v21 = vmax.f32 %v806_v19, 0.0  ;;  %1445 = vmatmul.msk.f32.vlgmr.msra.gmra.mxu2 %vm826_vm2, %v1883_v42  ;;  %1447 = vmatmul.msk.f32.vlgmr.msra.gmra.mxu3 %vm826_vm2, %v1883_v42 }
 0x121   : > { %1442 = vmatmul.msk.f32.gmra.mxu0 %vm826_vm2, %v1894_v48  ;;  %1444 = vmatmul.msk.f32.gmra.mxu1 %vm826_vm2, %v1894_v48 }
 0x122   : > { %1170 = vmatpush.msrb.mxu2 %v822_v20  ;;  %1193 = vmatpush.msrb.mxu3 %v823_v21 }
 0x128   : > { %1446 = vmatmul.msk.f32.gmra.mxu2 %vm826_vm2, %v1894_v48  ;;  %1448 = vmatmul.msk.f32.gmra.mxu3 %vm826_vm2, %v1894_v48 }
 0x129   : > { %1449 = vmatmul.msk.f32.vlgmr.msrb.gmra.mxu0 %vm826_vm2, %v1883_v42  ;;  %1451 = vmatmul.msk.f32.vlgmr.msrb.gmra.mxu1 %vm826_vm2, %v1883_v42 }
 0x130   : > { %1453 = vmatmul.msk.f32.vlgmr.msrb.gmra.mxu2 %vm826_vm2, %v1883_v42  ;;  %1455 = vmatmul.msk.f32.vlgmr.msrb.gmra.mxu3 %vm826_vm2, %v1883_v42 }
 0x131   : > { %1450 = vmatmul.msk.f32.gmra.mxu0 %vm826_vm2, %v1894_v48  ;;  %1452 = vmatmul.msk.f32.gmra.mxu1 %vm826_vm2, %v1894_v48 }
 0x138   : > { %1454 = vmatmul.msk.f32.gmra.mxu2 %vm826_vm2, %v1894_v48  ;;  %1456 = vmatmul.msk.f32.gmra.mxu3 %vm826_vm2, %v1894_v48 }
 0x175   : > { %v850_v22 = vpop.f32.mrf.mxu0  ;;  %v873_v23 = vpop.f32.mrf.mxu1 }
 0x176   : > { %v1203_v24 = vadd.f32 %v873_v23, %v850_v22 }
 0x178   : > { %1204 = vadd.xlane.f32.xlu0 %v1203_v24 }
 0x17d   : > { %v853_v25 = vpop.f32.mrf.mxu0  ;;  %v876_v26 = vpop.f32.mrf.mxu1 }
 0x17e   : > { %v1207_v27 = vsel %vm1206_vm3, %v853_v25, 0.0  ;;  %v1208_v28 = vsel %vm1206_vm3, %v876_v26, 0.0 }
 0x17f   : > { %v1209_v29 = vadd.f32 %v1208_v28, %v1207_v27 }
 0x181   : > { %1210 = vadd.xlane.f32.xlu1 %v1209_v29 }
 0x182   : > { %v896_v30 = vpop.f32.mrf.mxu2  ;;  %v919_v31 = vpop.f32.mrf.mxu3 }
 0x183   : > { %v1217_v35 = vadd.f32 %v919_v31, %v896_v30 }
 0x185   : > { %v942_v32 = vpop.f32.mrf.mxu0  ;;  %v965_v33 = vpop.f32.mrf.mxu1 }
 0x186   : > { %v1230_v34 = vadd.f32 %v965_v33, %v942_v32 }
 0x188   : > { %1231 = vadd.xlane.f32.xlu2 %v1230_v34 }
 0x189   : > { %1218 = vadd.xlane.f32.xlu1 %v1217_v35  ;;  %v1201_v35 = vlaneseq }
 0x18a   : > { %v899_v36 = vpop.f32.mrf.mxu2  ;;  %v922_v37 = vpop.f32.mrf.mxu3 }
 0x18b   : > { %v1220_v38 = vsel %vm1206_vm3, %v899_v36, 0.0  ;;  %v1221_v39 = vsel %vm1206_vm3, %v922_v37, 0.0  ;;  %v1202_v36 = vand.u32 127, %v1201_v35 }
 0x18c   : > { %v1222_v16 = vadd.f32 %v1221_v39, %v1220_v38 }
 0x18d   : > { %vm1225_vm4 = vcmp.eq.s32.totalorder %v1202_v36, 1  ;;  %vm1212_vm5 = vcmp.eq.s32.totalorder %v1202_v36, 0  ;;  %vm1238_vm6 = vcmp.eq.s32.totalorder %v1202_v36, 2  ;;  %vm1251_vm7 = vcmp.eq.s32.totalorder %v1202_v36, 3 }
 0x18e   : > { %v945_v40 = vpop.f32.mrf.mxu0  ;;  %v968_v41 = vpop.f32.mrf.mxu1  ;;  %vm1264_vm8 = vcmp.eq.s32.totalorder %v1202_v36, 4  ;;  %vm1277_vm9 = vcmp.eq.s32.totalorder %v1202_v36, 5  ;;  %vm1290_vm10 = vcmp.eq.s32.totalorder %v1202_v36, 6  ;;  %vm1303_vm11 = vcmp.eq.s32.totalorder %v1202_v36, 7 }
 0x18f   : > { %v1233_v43 = vsel %vm1206_vm3, %v945_v40, 0.0  ;;  %v1234_v44 = vsel %vm1206_vm3, %v968_v41, 0.0 }
 0x190   : > { %1223 = vadd.xlane.f32.xlu2 %v1222_v16  ;;  %v1235_v45 = vadd.f32 %v1234_v44, %v1233_v43 }
 0x192   : > { %1236 = vadd.xlane.f32.xlu1 %v1235_v45 }
 0x193   : > { %v988_v46 = vpop.f32.mrf.mxu2  ;;  %v1011_v47 = vpop.f32.mrf.mxu3 }
 0x194   : > { %v1243_v49 = vadd.f32 %v1011_v47, %v988_v46 }
 0x196   : > { %v1034_v50 = vpop.f32.mrf.mxu0  ;;  %v1057_v51 = vpop.f32.mrf.mxu1 }
 0x197   : > { %v1256_v57 = vadd.f32 %v1057_v51, %v1034_v50 }
 0x198   : > { %1244 = vadd.xlane.f32.xlu2 %v1243_v49 }
 0x19b   : > { %v991_v52 = vpop.f32.mrf.mxu2  ;;  %v1014_v53 = vpop.f32.mrf.mxu3 }
 0x19c   : > { %v1246_v54 = vsel %vm1206_vm3, %v991_v52, 0.0  ;;  %v1247_v55 = vsel %vm1206_vm3, %v1014_v53, 0.0 }
 0x19d   : > { %v1248_v56 = vadd.f32 %v1247_v55, %v1246_v54 }
 0x19e   : > { %v1037_v58 = vpop.f32.mrf.mxu0  ;;  %v1060_v59 = vpop.f32.mrf.mxu1 }
 0x19f   : > { %1249 = vadd.xlane.f32.xlu1 %v1248_v56  ;;  %v1259_v60 = vsel %vm1206_vm3, %v1037_v58, 0.0  ;;  %v1260_v61 = vsel %vm1206_vm3, %v1060_v59, 0.0 }
 0x1a0   : > { %1257 = vadd.xlane.f32.xlu2 %v1256_v57  ;;  %v1261_v1 = vadd.f32 %v1260_v61, %v1259_v60 }
 0x1a3   : > { %v1080_v63 = vpop.f32.mrf.mxu2  ;;  %v1103_v0 = vpop.f32.mrf.mxu3 }
 0x1a4   : > { %v1269_v2 = vadd.f32 %v1103_v0, %v1080_v63 }
 0x1a6   : > { %v1126_v3 = vpop.f32.mrf.mxu0  ;;  %v1149_v4 = vpop.f32.mrf.mxu1 }
 0x1a7   : > { %1262 = vadd.xlane.f32.xlu1 %v1261_v1  ;;  %v1282_v10 = vadd.f32 %v1149_v4, %v1126_v3 }
 0x1a8   : > { %1270 = vadd.xlane.f32.xlu2 %v1269_v2 }
 0x1ab   : > { %v1083_v5 = vpop.f32.mrf.mxu2  ;;  %v1106_v6 = vpop.f32.mrf.mxu3 }
 0x1ac   : > { %v1272_v7 = vsel %vm1206_vm3, %v1083_v5, 0.0  ;;  %v1273_v8 = vsel %vm1206_vm3, %v1106_v6, 0.0 }
 0x1ad   : > { %v1274_v9 = vadd.f32 %v1273_v8, %v1272_v7 }
 0x1ae   : > { %v1129_v11 = vpop.f32.mrf.mxu0  ;;  %v1152_v12 = vpop.f32.mrf.mxu1 }
 0x1af   : > { %1275 = vadd.xlane.f32.xlu1 %v1274_v9  ;;  %v1285_v13 = vsel %vm1206_vm3, %v1129_v11, 0.0  ;;  %v1286_v14 = vsel %vm1206_vm3, %v1152_v12, 0.0 }
 0x1b0   : > { %1283 = vadd.xlane.f32.xlu2 %v1282_v10  ;;  %v1287_v18 = vadd.f32 %v1286_v14, %v1285_v13 }
 0x1b3   : > { %v1172_v15 = vpop.f32.mrf.mxu2  ;;  %v1195_v17 = vpop.f32.mrf.mxu3 }
 0x1b4   : > { %v1295_v19 = vadd.f32 %v1195_v17, %v1172_v15 }
 0x1b7   : > { %1288 = vadd.xlane.f32.xlu1 %v1287_v18 }
 0x1b8   : > { %1296 = vadd.xlane.f32.xlu2 %v1295_v19 }
 0x1bb   : > { %v1175_v20 = vpop.f32.mrf.mxu2  ;;  %v1198_v21 = vpop.f32.mrf.mxu3 }
 0x1bc   : > { %v1298_v22 = vsel %vm1206_vm3, %v1175_v20, 0.0  ;;  %v1299_v23 = vsel %vm1206_vm3, %v1198_v21, 0.0 }
 0x1bd   : > { %v1300_v24 = vadd.f32 %v1299_v23, %v1298_v22 }
 0x1bf   : > { %1301 = vadd.xlane.f32.xlu0 %v1300_v24 }
 0x1d0   : > { %1311 = vperm.xlu1 %1490, %v1883_v42   ;;  %1315 = vperm.xlu2 %1491, %v1894_v48  }
 0x1eb   : > { %v1205_v16 = vpop.xlane.xlu0 %1204 }
 0x1ec   : > { %v1213_v51 = vsel %vm1212_vm5, %v1205_v16, 0.0 }
 0x1f4   : > { %v1211_v25 = vpop.xlane.xlu1 %1210 }
 0x1f5   : > { %v1214_v42 = vsel %vm1212_vm5, %v1211_v25, 0.0 }
 0x1fb   : > { %v1232_v26 = vpop.xlane.xlu2 %1231 }
 0x1fc   : > { %v1219_v27 = vpop.xlane.xlu1 %1218  ;;  %v1239_v55 = vsel %vm1238_vm6, %v1232_v26, 0.0 }
 0x1fd   : > { %v1226_v45 = vsel %vm1225_vm4, %v1219_v27, 0.0 }
 0x1fe   : > { %v1228_v53 = vadd.f32 %v1226_v45, %v1213_v51 }
 0x200   : > { %v1241_v60 = vadd.f32 %v1239_v55, %v1228_v53 }
 0x203   : > { %v1224_v28 = vpop.xlane.xlu2 %1223 }
 0x204   : > { %v1227_v38 = vsel %vm1225_vm4, %v1224_v28, 0.0 }
 0x205   : > { %v1237_v29 = vpop.xlane.xlu1 %1236  ;;  %v1229_v48 = vadd.f32 %v1227_v38, %v1214_v42 }
 0x206   : > { %v1240_v40 = vsel %vm1238_vm6, %v1237_v29, 0.0 }
 0x207   : > { %v1242_v43 = vadd.f32 %v1240_v40, %v1229_v48 }
 0x20b   : > { %v1245_v30 = vpop.xlane.xlu2 %1244 }
 0x20c   : > { %v1252_v57 = vsel %vm1251_vm7, %v1245_v30, 0.0 }
 0x20d   : > { %v1254_v0 = vadd.f32 %v1252_v57, %v1241_v60 }
 0x212   : > { %v1250_v31 = vpop.xlane.xlu1 %1249 }
 0x213   : > { %v1258_v32 = vpop.xlane.xlu2 %1257  ;;  %v1253_v41 = vsel %vm1251_vm7, %v1250_v31, 0.0 }
 0x214   : > { %v1255_v46 = vadd.f32 %v1253_v41, %v1242_v43  ;;  %v1265_v62 = vsel %vm1264_vm8, %v1258_v32, 0.0 }
 0x215   : > { %v1267_v4 = vadd.f32 %v1265_v62, %v1254_v0 }
 0x21a   : > { %v1263_v33 = vpop.xlane.xlu1 %1262 }
 0x21b   : > { %v1271_v34 = vpop.xlane.xlu2 %1270  ;;  %v1266_v44 = vsel %vm1264_vm8, %v1263_v33, 0.0 }
 0x21c   : > { %v1268_v52 = vadd.f32 %v1266_v44, %v1255_v46  ;;  %v1278_v2 = vsel %vm1277_vm9, %v1271_v34, 0.0 }
 0x21d   : > { %v1280_v7 = vadd.f32 %v1278_v2, %v1267_v4 }
 0x222   : > { %v1276_v37 = vpop.xlane.xlu1 %1275 }
 0x223   : > { %v1284_v39 = vpop.xlane.xlu2 %1283  ;;  %v1279_v49 = vsel %vm1277_vm9, %v1276_v37, 0.0 }
 0x224   : > { %v1281_v56 = vadd.f32 %v1279_v49, %v1268_v52  ;;  %v1291_v5 = vsel %vm1290_vm10, %v1284_v39, 0.0 }
 0x225   : > { %v1293_v9 = vadd.f32 %v1291_v5, %v1280_v7 }
 0x22a   : > { %v1289_v47 = vpop.xlane.xlu1 %1288 }
 0x22b   : > { %v1297_v50 = vpop.xlane.xlu2 %1296  ;;  %v1292_v54 = vsel %vm1290_vm10, %v1289_v47, 0.0 }
 0x22c   : > { %v1294_v58 = vadd.f32 %v1292_v54, %v1281_v56  ;;  %v1304_v8 = vsel %vm1303_vm11, %v1297_v50, 0.0 }
 0x22d   : > { %v1306_v10 = vadd.f32 %v1304_v8, %v1293_v9 }
 0x22f   : > { %v1308_v11 = vmul.f32 0.00390625, %v1306_v10 }
 0x232   : > { %v1302_v59 = vpop.xlane.xlu0 %1301 }
 0x233   : > { %v1305_v61 = vsel %vm1303_vm11, %v1302_v59, 0.0  ;;  %v1316_v1 = vpop.permute.xlu2 %1315 }
 0x234   : > { %v1307_v63 = vadd.f32 %v1305_v61, %v1294_v58 }
 0x236   : > { %v1309_v3 = vmul.f32 0.00390625, %v1307_v63 }
 0x238   : > { %v1319_v6 = vadd.f32 %v1316_v1, %v1309_v3 }
 0x23a   : > { %1322 = vst.msk [vmem:[%s349_s12 + $0x8] sm:$0x3] %vm1321_vm12, %v1319_v6 }
 0x242   : > { %v1312_v12 = vpop.permute.xlu1 %1311 }
 0x243   : > { %v1318_v13 = vadd.f32 %v1312_v12, %v1308_v11 }
 0x245   : > { %1320 = vst.msk [vmem:[%s349_s12] sm:$0xff] %vm826_vm2, %v1318_v13 }
 0x246 PF: > { %p10_p9 = scmp.ge.s32.totalorder %s1556_s16, 6   ;;  %s2022_s12 = smov %s1511_s13 }
 0x247   : > { %s2023_s13 = smov %s1565_s19  ;;  %s2024_s14 = smov %s1556_s16 }
 0x248   :  { %12 = sbr.rel (!%p10_p9) target bundleno = 2 (0x2), region = 90 }

</bundles_post_ra>
